<compile_context>
chip_gen: v5e
topology: v5e:2x2
jax: 0.10.0
libtpu: 0.0.40
codegen_flags: <defaults>
</compile_context>

<pallas_src>
import jax
import jax.numpy as jnp
from jax import lax
from jax.experimental import pallas as pl
from jax.experimental.pallas import tpu as pltpu  # noqa: F401  (TPU backend)

# ---- problem sizes (small, consistent with the module) ----
B = 2              # batch
N = 8              # sequence length
C = 32             # dim_self (= dim_ref, since y=None -> self attention)
H = 4              # num_heads
HD = C // H        # head dim
BN = B * N
MLP_H = int(C * 4.0)   # mlp_ratio = 4.0
EPS = 1e-5
SCALE = HD ** (-0.5)

# Row indices inside the packed (8, MLP_H) vector-parameter slab.
_G1, _BE1, _BP, _G2, _BE2, _BF1, _BF2 = range(7)


def _layer_norm(v, g, b):
    mu = jnp.mean(v, axis=-1, keepdims=True)
    var = jnp.mean((v - mu) ** 2, axis=-1, keepdims=True)
    return (v - mu) * lax.rsqrt(var + EPS) * g + b


def _bdot(a, b, a_contract, b_contract):
    """Leading-dim-batched matmul (dim 0 is batch), fp32 accumulation."""
    return lax.dot_general(
        a, b,
        dimension_numbers=(((a_contract,), (b_contract,)), ((0,), (0,))),
        preferred_element_type=jnp.float32)


def transformer_layer_kernel(x_ref, vec_ref, w4_ref, w1_ref, w2_ref, o_ref):
    # Whole problem in one invocation: x is the fused (B*N, C) slab.
    x = x_ref[...]                                   # (BN, C)
    vec = vec_ref[...]                               # (8, MLP_H) packed 1-D params

    g1  = vec[_G1:_G1 + 1, :C]
    be1 = vec[_BE1:_BE1 + 1, :C]
    bp  = vec[_BP:_BP + 1, :C]
    g2  = vec[_G2:_G2 + 1, :C]
    be2 = vec[_BE2:_BE2 + 1, :C]
    bf1 = vec[_BF1:_BF1 + 1, :]                      # (1, MLP_H)
    bf2 = vec[_BF2:_BF2 + 1, :C]

    # ---- norm1 + multi-head self attention ----
    h1 = _layer_norm(x, g1, be1)                     # (BN, C)

    # Full-width projections on the un-replicated slab (16x32x32 MXU pushes).
    q = jnp.dot(h1, w4_ref[0], preferred_element_type=jnp.float32)   # (BN, C)
    k = jnp.dot(h1, w4_ref[1], preferred_element_type=jnp.float32)
    v = jnp.dot(h1, w4_ref[2], preferred_element_type=jnp.float32)
    wp = w4_ref[3]                                   # (C, C)

    # Major-dim reshape (free): (BN, C) -> (B, N, C).
    q3 = q.reshape(B, N, C)
    k3 = k.reshape(B, N, C)
    v3 = v.reshape(B, N, C)

    # Per-head score / softmax / p@v, batched over B only; static unrolled H=4.
    # Output projection accumulated head-by-head in fp32 (no lane concat needed).
    proj = None
    for h in range(H):
        lo = h * HD
        qh = q3[:, :, lo:lo + HD]                    # (B, N, HD) static lane slice
        kh = k3[:, :, lo:lo + HD]
        vh = v3[:, :, lo:lo + HD]

        s = _bdot(qh, kh, 2, 2) * SCALE              # (B, N, N)
        s = s - jnp.max(s, axis=-1, keepdims=True)
        p = jnp.exp(s)
        p = p * pl.reciprocal(jnp.sum(p, axis=-1, keepdims=True), approx=True)

        ctx_h = _bdot(p, vh, 2, 1).reshape(BN, HD)   # (BN, HD)
        part = jnp.dot(ctx_h, wp[lo:lo + HD, :],
                       preferred_element_type=jnp.float32)            # (BN, C)
        proj = part if proj is None else proj + part

    x1 = x + proj + bp                               # residual 1

    # ---- norm2 + MLP (row-wise on the fused slab) ----
    h2 = _layer_norm(x1, g2, be2)
    hid = jnp.maximum(
        jnp.dot(h2, w1_ref[...], preferred_element_type=jnp.float32) + bf1, 0.0)
    mlp = jnp.dot(hid, w2_ref[...], preferred_element_type=jnp.float32) + bf2

    # TODO(synk): output last dim is 32 (<128 lanes) -> masked stores; a lane-dense
    # (4,128) output layout would require an in-kernel relayout that does not pay
    # off at 2 KiB of writeback; revisit when N*C grows.
    o_ref[...] = (x1 + mlp).astype(o_ref.dtype)      # residual 2


def _pack_params(params):
    """Trace-time (XLA, outside the kernel) packing of parameters.

    Returns:
      vec : (8, MLP_H)  — rows = [g1, be1, bp, g2, be2, bf1, bf2, pad]
      w4  : (4, C, C)   — [Wq, Wk, Wv, Wproj]  (Wk/Wv split out of Wkv)
      w1  : (C, MLP_H)
      w2  : (MLP_H, C)
    """
    (g1, be1, wq, wkv, wp, bp, g2, be2, w1, bf1, w2, bf2) = params
    w4 = jnp.stack([wq, wkv[:, :C], wkv[:, C:], wp], axis=0)

    vec = jnp.zeros((8, MLP_H), jnp.float32)
    vec = vec.at[_G1, :C].set(g1[0])
    vec = vec.at[_BE1, :C].set(be1[0])
    vec = vec.at[_BP, :C].set(bp[0])
    vec = vec.at[_G2, :C].set(g2[0])
    vec = vec.at[_BE2, :C].set(be2[0])
    vec = vec.at[_BF1, :].set(bf1[0])
    vec = vec.at[_BF2, :C].set(bf2[0])
    return vec, w4, w1, w2


def transformer_layer(x, params):
    vec, w4, w1, w2 = _pack_params(params)
    x2 = x.reshape(BN, C)

    # Single invocation, no grid: every operand gets a full-array VMEM block.
    out = pl.pallas_call(
        transformer_layer_kernel,
        out_shape=jax.ShapeDtypeStruct((BN, C), jnp.float32),
    )(x2, vec, w4, w1, w2)

    return out.reshape(B, N, C)


def transformer_layer_ref(x, params):
    """Pure-JAX reference mirroring the PyTorch forward."""
    (g1, be1, wq, wkv, wp, bp, g2, be2, w1, bf1, w2, bf2) = params

    def ln(v, g, b):
        mu = jnp.mean(v, axis=-1, keepdims=True)
        var = jnp.mean((v - mu) ** 2, axis=-1, keepdims=True)
        return (v - mu) / jnp.sqrt(var + EPS) * g + b

    h1 = ln(x, g1[0], be1[0])
    q = (h1 @ wq).reshape(B, N, H, HD)
    kv = (h1 @ wkv).reshape(B, N, 2, H, HD)
    k, v = kv[:, :, 0], kv[:, :, 1]
    att = jnp.einsum('bnhd,bmhd->bnmh', q, k) * SCALE
    att = jax.nn.softmax(att, axis=2)
    out = jnp.einsum('bnmh,bmhd->bnhd', att, v).reshape(B, N, C)
    out = out @ wp + bp[0]
    x1 = x + out
    h2 = ln(x1, g2[0], be2[0])
    mlp = jnp.maximum(h2 @ w1 + bf1[0], 0.0) @ w2 + bf2[0]
    return x1 + mlp


def make_params(key):
    ks = jax.random.split(key, 12)
    s = 0.05
    g1 = jnp.ones((1, C), jnp.float32) + s * jax.random.normal(ks[0], (1, C))
    be1 = s * jax.random.normal(ks[1], (1, C))
    wq = s * jax.random.normal(ks[2], (C, C))          # bias=False
    wkv = s * jax.random.normal(ks[3], (C, 2 * C))     # bias=False
    wp = s * jax.random.normal(ks[4], (C, C))
    bp = s * jax.random.normal(ks[5], (1, C))
    g2 = jnp.ones((1, C), jnp.float32) + s * jax.random.normal(ks[6], (1, C))
    be2 = s * jax.random.normal(ks[7], (1, C))
    w1 = s * jax.random.normal(ks[8], (C, MLP_H))
    bf1 = s * jax.random.normal(ks[9], (1, MLP_H))
    w2 = s * jax.random.normal(ks[10], (MLP_H, C))
    bf2 = s * jax.random.normal(ks[11], (1, C))
    return tuple(jnp.asarray(p, jnp.float32) for p in
                 (g1, be1, wq, wkv, wp, bp, g2, be2, w1, bf1, w2, bf2))


if __name__ == "__main__":
    key = jax.random.PRNGKey(0)
    kx, kp = jax.random.split(key)
    x = jax.random.normal(kx, (B, N, C), jnp.float32)
    params = make_params(kp)

    out = transformer_layer(x, params)
    out = jax.block_until_ready(out)

    ref = transformer_layer_ref(x, params)
    assert out.shape == (B, N, C)
    # 2e-4 absorbs the approx (EUP) softmax reciprocal; observed error is well under.
    assert jnp.max(jnp.abs(out - ref)) < 2e-4, jnp.max(jnp.abs(out - ref))

    print("KERNEL_OK")
</pallas_src>

<mosaic_0001>
module attributes {stable_mosaic.version = 11 : i64} {
  func.func @transformer_layer_kernel(%arg0: memref<16x32xf32, #tpu.memory_space<vmem>>, %arg1: memref<8x128xf32, #tpu.memory_space<vmem>>, %arg2: memref<4x32x32xf32, #tpu.memory_space<vmem>>, %arg3: memref<32x128xf32, #tpu.memory_space<vmem>>, %arg4: memref<128x32xf32, #tpu.memory_space<vmem>>, %arg5: memref<16x32xf32, #tpu.memory_space<vmem>>) attributes {dimension_semantics = [], scalar_prefetch = 0 : i64, scratch_operands = 0 : i64, tpu.core_type = #tpu.core_type<tc>} {
    %c0 = arith.constant 0 : index
    %c0_0 = arith.constant 0 : index
    %0 = vector.load %arg0[%c0, %c0_0] : memref<16x32xf32, #tpu.memory_space<vmem>>, vector<16x32xf32>
    %c0_1 = arith.constant 0 : index
    %c0_2 = arith.constant 0 : index
    %1 = vector.load %arg1[%c0_1, %c0_2] : memref<8x128xf32, #tpu.memory_space<vmem>>, vector<8x128xf32>
    %2 = vector.extract_strided_slice %1 {offsets = [0, 0], sizes = [1, 32], strides = [1, 1]} : vector<8x128xf32> to vector<1x32xf32>
    %3 = vector.extract_strided_slice %1 {offsets = [1, 0], sizes = [1, 32], strides = [1, 1]} : vector<8x128xf32> to vector<1x32xf32>
    %4 = vector.extract_strided_slice %1 {offsets = [2, 0], sizes = [1, 32], strides = [1, 1]} : vector<8x128xf32> to vector<1x32xf32>
    %5 = vector.extract_strided_slice %1 {offsets = [3, 0], sizes = [1, 32], strides = [1, 1]} : vector<8x128xf32> to vector<1x32xf32>
    %6 = vector.extract_strided_slice %1 {offsets = [4, 0], sizes = [1, 32], strides = [1, 1]} : vector<8x128xf32> to vector<1x32xf32>
    %7 = vector.extract_strided_slice %1 {offsets = [5, 0], sizes = [1, 128], strides = [1, 1]} : vector<8x128xf32> to vector<1x128xf32>
    %8 = vector.extract_strided_slice %1 {offsets = [6, 0], sizes = [1, 32], strides = [1, 1]} : vector<8x128xf32> to vector<1x32xf32>
    %cst = arith.constant dense<0.000000e+00> : vector<16xf32>
    %9 = vector.multi_reduction <add>, %0, %cst [1] : vector<16x32xf32> to vector<16xf32>
    %10 = vector.shape_cast %9 : vector<16xf32> to vector<16x1xf32>
    %cst_3 = arith.constant 3.200000e+01 : f32
    %11 = vector.broadcast %cst_3 : f32 to vector<16x1xf32>
    %12 = arith.divf %10, %11 : vector<16x1xf32>
    %13 = vector.broadcast %12 : vector<16x1xf32> to vector<16x32xf32>
    %14 = arith.subf %0, %13 : vector<16x32xf32>
    %15 = arith.mulf %14, %14 : vector<16x32xf32>
    %cst_4 = arith.constant dense<0.000000e+00> : vector<16xf32>
    %16 = vector.multi_reduction <add>, %15, %cst_4 [1] : vector<16x32xf32> to vector<16xf32>
    %17 = vector.shape_cast %16 : vector<16xf32> to vector<16x1xf32>
    %cst_5 = arith.constant 3.200000e+01 : f32
    %18 = vector.broadcast %cst_5 : f32 to vector<16x1xf32>
    %19 = arith.divf %17, %18 : vector<16x1xf32>
    %20 = vector.broadcast %12 : vector<16x1xf32> to vector<16x32xf32>
    %21 = arith.subf %0, %20 : vector<16x32xf32>
    %cst_6 = arith.constant 9.99999974E-6 : f32
    %22 = vector.broadcast %cst_6 : f32 to vector<16x1xf32>
    %23 = arith.addf %19, %22 : vector<16x1xf32>
    %24 = math.rsqrt %23 : vector<16x1xf32>
    %25 = vector.broadcast %24 : vector<16x1xf32> to vector<16x32xf32>
    %26 = arith.mulf %21, %25 : vector<16x32xf32>
    %27 = vector.broadcast %2 : vector<1x32xf32> to vector<16x32xf32>
    %28 = arith.mulf %26, %27 : vector<16x32xf32>
    %29 = vector.broadcast %3 : vector<1x32xf32> to vector<16x32xf32>
    %30 = arith.addf %28, %29 : vector<16x32xf32>
    %c0_7 = arith.constant 0 : index
    %c0_8 = arith.constant 0 : index
    %c0_9 = arith.constant 0 : index
    %31 = vector.load %arg2[%c0_7, %c0_8, %c0_9] : memref<4x32x32xf32, #tpu.memory_space<vmem>>, vector<1x32x32xf32>
    %32 = vector.shape_cast %31 : vector<1x32x32xf32> to vector<32x32xf32>
    %cst_10 = arith.constant dense<0.000000e+00> : vector<16x32xf32>
    %33 = tpu.matmul %30, %32, %cst_10 {dimension_numbers = #tpu.dot_dimension_numbers<[1], [0], [0], [1], [0, 0, 1, 1], [], []>} : vector<16x32xf32>, vector<32x32xf32>, vector<16x32xf32> -> vector<16x32xf32>
    %c1 = arith.constant 1 : index
    %c0_11 = arith.constant 0 : index
    %c0_12 = arith.constant 0 : index
    %34 = vector.load %arg2[%c1, %c0_11, %c0_12] : memref<4x32x32xf32, #tpu.memory_space<vmem>>, vector<1x32x32xf32>
    %35 = vector.shape_cast %34 : vector<1x32x32xf32> to vector<32x32xf32>
    %cst_13 = arith.constant dense<0.000000e+00> : vector<16x32xf32>
    %36 = tpu.matmul %30, %35, %cst_13 {dimension_numbers = #tpu.dot_dimension_numbers<[1], [0], [0], [1], [0, 0, 1, 1], [], []>} : vector<16x32xf32>, vector<32x32xf32>, vector<16x32xf32> -> vector<16x32xf32>
    %c2 = arith.constant 2 : index
    %c0_14 = arith.constant 0 : index
    %c0_15 = arith.constant 0 : index
    %37 = vector.load %arg2[%c2, %c0_14, %c0_15] : memref<4x32x32xf32, #tpu.memory_space<vmem>>, vector<1x32x32xf32>
    %38 = vector.shape_cast %37 : vector<1x32x32xf32> to vector<32x32xf32>
    %cst_16 = arith.constant dense<0.000000e+00> : vector<16x32xf32>
    %39 = tpu.matmul %30, %38, %cst_16 {dimension_numbers = #tpu.dot_dimension_numbers<[1], [0], [0], [1], [0, 0, 1, 1], [], []>} : vector<16x32xf32>, vector<32x32xf32>, vector<16x32xf32> -> vector<16x32xf32>
    %c3 = arith.constant 3 : index
    %c0_17 = arith.constant 0 : index
    %c0_18 = arith.constant 0 : index
    %40 = vector.load %arg2[%c3, %c0_17, %c0_18] : memref<4x32x32xf32, #tpu.memory_space<vmem>>, vector<1x32x32xf32>
    %41 = vector.shape_cast %40 : vector<1x32x32xf32> to vector<32x32xf32>
    %42 = vector.shape_cast %33 : vector<16x32xf32> to vector<2x8x32xf32>
    %43 = vector.shape_cast %36 : vector<16x32xf32> to vector<2x8x32xf32>
    %44 = vector.shape_cast %39 : vector<16x32xf32> to vector<2x8x32xf32>
    %45 = vector.extract_strided_slice %42 {offsets = [0, 0, 0], sizes = [2, 8, 8], strides = [1, 1, 1]} : vector<2x8x32xf32> to vector<2x8x8xf32>
    %46 = vector.extract_strided_slice %43 {offsets = [0, 0, 0], sizes = [2, 8, 8], strides = [1, 1, 1]} : vector<2x8x32xf32> to vector<2x8x8xf32>
    %47 = vector.extract_strided_slice %44 {offsets = [0, 0, 0], sizes = [2, 8, 8], strides = [1, 1, 1]} : vector<2x8x32xf32> to vector<2x8x8xf32>
    %cst_19 = arith.constant dense<0.000000e+00> : vector<2x8x8xf32>
    %48 = tpu.matmul %45, %46, %cst_19 {dimension_numbers = #tpu.dot_dimension_numbers<[2], [2], [1], [1], [0, 0, 0, 1, 1, 1], [0], [0]>} : vector<2x8x8xf32>, vector<2x8x8xf32>, vector<2x8x8xf32> -> vector<2x8x8xf32>
    %cst_20 = arith.constant 0.353553385 : f32
    %49 = vector.broadcast %cst_20 : f32 to vector<2x8x8xf32>
    %50 = arith.mulf %48, %49 : vector<2x8x8xf32>
    %cst_21 = arith.constant dense<0xFF800000> : vector<2x8xf32>
    %51 = vector.multi_reduction <maximumf>, %50, %cst_21 [2] : vector<2x8x8xf32> to vector<2x8xf32>
    %52 = vector.shape_cast %51 : vector<2x8xf32> to vector<2x8x1xf32>
    %53 = vector.broadcast %52 : vector<2x8x1xf32> to vector<2x8x8xf32>
    %54 = arith.subf %50, %53 : vector<2x8x8xf32>
    %55 = math.exp %54 : vector<2x8x8xf32>
    %cst_22 = arith.constant dense<0.000000e+00> : vector<2x8xf32>
    %56 = vector.multi_reduction <add>, %55, %cst_22 [2] : vector<2x8x8xf32> to vector<2x8xf32>
    %57 = vector.shape_cast %56 : vector<2x8xf32> to vector<2x8x1xf32>
    %58 = tpu.reciprocal %57 {approx = true} : vector<2x8x1xf32> -> vector<2x8x1xf32>
    %59 = vector.broadcast %58 : vector<2x8x1xf32> to vector<2x8x8xf32>
    %60 = arith.mulf %55, %59 : vector<2x8x8xf32>
    %cst_23 = arith.constant dense<0.000000e+00> : vector<2x8x8xf32>
    %61 = tpu.matmul %60, %47, %cst_23 {dimension_numbers = #tpu.dot_dimension_numbers<[2], [1], [1], [2], [0, 0, 0, 1, 1, 2], [0], [0]>} : vector<2x8x8xf32>, vector<2x8x8xf32>, vector<2x8x8xf32> -> vector<2x8x8xf32>
    %62 = vector.shape_cast %61 : vector<2x8x8xf32> to vector<16x8xf32>
    %63 = vector.extract_strided_slice %41 {offsets = [0, 0], sizes = [8, 32], strides = [1, 1]} : vector<32x32xf32> to vector<8x32xf32>
    %cst_24 = arith.constant dense<0.000000e+00> : vector<16x32xf32>
    %64 = tpu.matmul %62, %63, %cst_24 {dimension_numbers = #tpu.dot_dimension_numbers<[1], [0], [0], [1], [0, 0, 1, 1], [], []>} : vector<16x8xf32>, vector<8x32xf32>, vector<16x32xf32> -> vector<16x32xf32>
    %65 = vector.extract_strided_slice %42 {offsets = [0, 0, 8], sizes = [2, 8, 8], strides = [1, 1, 1]} : vector<2x8x32xf32> to vector<2x8x8xf32>
    %66 = vector.extract_strided_slice %43 {offsets = [0, 0, 8], sizes = [2, 8, 8], strides = [1, 1, 1]} : vector<2x8x32xf32> to vector<2x8x8xf32>
    %67 = vector.extract_strided_slice %44 {offsets = [0, 0, 8], sizes = [2, 8, 8], strides = [1, 1, 1]} : vector<2x8x32xf32> to vector<2x8x8xf32>
    %cst_25 = arith.constant dense<0.000000e+00> : vector<2x8x8xf32>
    %68 = tpu.matmul %65, %66, %cst_25 {dimension_numbers = #tpu.dot_dimension_numbers<[2], [2], [1], [1], [0, 0, 0, 1, 1, 1], [0], [0]>} : vector<2x8x8xf32>, vector<2x8x8xf32>, vector<2x8x8xf32> -> vector<2x8x8xf32>
    %cst_26 = arith.constant 0.353553385 : f32
    %69 = vector.broadcast %cst_26 : f32 to vector<2x8x8xf32>
    %70 = arith.mulf %68, %69 : vector<2x8x8xf32>
    %cst_27 = arith.constant dense<0xFF800000> : vector<2x8xf32>
    %71 = vector.multi_reduction <maximumf>, %70, %cst_27 [2] : vector<2x8x8xf32> to vector<2x8xf32>
    %72 = vector.shape_cast %71 : vector<2x8xf32> to vector<2x8x1xf32>
    %73 = vector.broadcast %72 : vector<2x8x1xf32> to vector<2x8x8xf32>
    %74 = arith.subf %70, %73 : vector<2x8x8xf32>
    %75 = math.exp %74 : vector<2x8x8xf32>
    %cst_28 = arith.constant dense<0.000000e+00> : vector<2x8xf32>
    %76 = vector.multi_reduction <add>, %75, %cst_28 [2] : vector<2x8x8xf32> to vector<2x8xf32>
    %77 = vector.shape_cast %76 : vector<2x8xf32> to vector<2x8x1xf32>
    %78 = tpu.reciprocal %77 {approx = true} : vector<2x8x1xf32> -> vector<2x8x1xf32>
    %79 = vector.broadcast %78 : vector<2x8x1xf32> to vector<2x8x8xf32>
    %80 = arith.mulf %75, %79 : vector<2x8x8xf32>
    %cst_29 = arith.constant dense<0.000000e+00> : vector<2x8x8xf32>
    %81 = tpu.matmul %80, %67, %cst_29 {dimension_numbers = #tpu.dot_dimension_numbers<[2], [1], [1], [2], [0, 0, 0, 1, 1, 2], [0], [0]>} : vector<2x8x8xf32>, vector<2x8x8xf32>, vector<2x8x8xf32> -> vector<2x8x8xf32>
    %82 = vector.shape_cast %81 : vector<2x8x8xf32> to vector<16x8xf32>
    %83 = vector.extract_strided_slice %41 {offsets = [8, 0], sizes = [8, 32], strides = [1, 1]} : vector<32x32xf32> to vector<8x32xf32>
    %cst_30 = arith.constant dense<0.000000e+00> : vector<16x32xf32>
    %84 = tpu.matmul %82, %83, %cst_30 {dimension_numbers = #tpu.dot_dimension_numbers<[1], [0], [0], [1], [0, 0, 1, 1], [], []>} : vector<16x8xf32>, vector<8x32xf32>, vector<16x32xf32> -> vector<16x32xf32>
    %85 = arith.addf %64, %84 : vector<16x32xf32>
    %86 = vector.extract_strided_slice %42 {offsets = [0, 0, 16], sizes = [2, 8, 8], strides = [1, 1, 1]} : vector<2x8x32xf32> to vector<2x8x8xf32>
    %87 = vector.extract_strided_slice %43 {offsets = [0, 0, 16], sizes = [2, 8, 8], strides = [1, 1, 1]} : vector<2x8x32xf32> to vector<2x8x8xf32>
    %88 = vector.extract_strided_slice %44 {offsets = [0, 0, 16], sizes = [2, 8, 8], strides = [1, 1, 1]} : vector<2x8x32xf32> to vector<2x8x8xf32>
    %cst_31 = arith.constant dense<0.000000e+00> : vector<2x8x8xf32>
    %89 = tpu.matmul %86, %87, %cst_31 {dimension_numbers = #tpu.dot_dimension_numbers<[2], [2], [1], [1], [0, 0, 0, 1, 1, 1], [0], [0]>} : vector<2x8x8xf32>, vector<2x8x8xf32>, vector<2x8x8xf32> -> vector<2x8x8xf32>
    %cst_32 = arith.constant 0.353553385 : f32
    %90 = vector.broadcast %cst_32 : f32 to vector<2x8x8xf32>
    %91 = arith.mulf %89, %90 : vector<2x8x8xf32>
    %cst_33 = arith.constant dense<0xFF800000> : vector<2x8xf32>
    %92 = vector.multi_reduction <maximumf>, %91, %cst_33 [2] : vector<2x8x8xf32> to vector<2x8xf32>
    %93 = vector.shape_cast %92 : vector<2x8xf32> to vector<2x8x1xf32>
    %94 = vector.broadcast %93 : vector<2x8x1xf32> to vector<2x8x8xf32>
    %95 = arith.subf %91, %94 : vector<2x8x8xf32>
    %96 = math.exp %95 : vector<2x8x8xf32>
    %cst_34 = arith.constant dense<0.000000e+00> : vector<2x8xf32>
    %97 = vector.multi_reduction <add>, %96, %cst_34 [2] : vector<2x8x8xf32> to vector<2x8xf32>
    %98 = vector.shape_cast %97 : vector<2x8xf32> to vector<2x8x1xf32>
    %99 = tpu.reciprocal %98 {approx = true} : vector<2x8x1xf32> -> vector<2x8x1xf32>
    %100 = vector.broadcast %99 : vector<2x8x1xf32> to vector<2x8x8xf32>
    %101 = arith.mulf %96, %100 : vector<2x8x8xf32>
    %cst_35 = arith.constant dense<0.000000e+00> : vector<2x8x8xf32>
    %102 = tpu.matmul %101, %88, %cst_35 {dimension_numbers = #tpu.dot_dimension_numbers<[2], [1], [1], [2], [0, 0, 0, 1, 1, 2], [0], [0]>} : vector<2x8x8xf32>, vector<2x8x8xf32>, vector<2x8x8xf32> -> vector<2x8x8xf32>
    %103 = vector.shape_cast %102 : vector<2x8x8xf32> to vector<16x8xf32>
    %104 = vector.extract_strided_slice %41 {offsets = [16, 0], sizes = [8, 32], strides = [1, 1]} : vector<32x32xf32> to vector<8x32xf32>
    %cst_36 = arith.constant dense<0.000000e+00> : vector<16x32xf32>
    %105 = tpu.matmul %103, %104, %cst_36 {dimension_numbers = #tpu.dot_dimension_numbers<[1], [0], [0], [1], [0, 0, 1, 1], [], []>} : vector<16x8xf32>, vector<8x32xf32>, vector<16x32xf32> -> vector<16x32xf32>
    %106 = arith.addf %85, %105 : vector<16x32xf32>
    %107 = vector.extract_strided_slice %42 {offsets = [0, 0, 24], sizes = [2, 8, 8], strides = [1, 1, 1]} : vector<2x8x32xf32> to vector<2x8x8xf32>
    %108 = vector.extract_strided_slice %43 {offsets = [0, 0, 24], sizes = [2, 8, 8], strides = [1, 1, 1]} : vector<2x8x32xf32> to vector<2x8x8xf32>
    %109 = vector.extract_strided_slice %44 {offsets = [0, 0, 24], sizes = [2, 8, 8], strides = [1, 1, 1]} : vector<2x8x32xf32> to vector<2x8x8xf32>
    %cst_37 = arith.constant dense<0.000000e+00> : vector<2x8x8xf32>
    %110 = tpu.matmul %107, %108, %cst_37 {dimension_numbers = #tpu.dot_dimension_numbers<[2], [2], [1], [1], [0, 0, 0, 1, 1, 1], [0], [0]>} : vector<2x8x8xf32>, vector<2x8x8xf32>, vector<2x8x8xf32> -> vector<2x8x8xf32>
    %cst_38 = arith.constant 0.353553385 : f32
    %111 = vector.broadcast %cst_38 : f32 to vector<2x8x8xf32>
    %112 = arith.mulf %110, %111 : vector<2x8x8xf32>
    %cst_39 = arith.constant dense<0xFF800000> : vector<2x8xf32>
    %113 = vector.multi_reduction <maximumf>, %112, %cst_39 [2] : vector<2x8x8xf32> to vector<2x8xf32>
    %114 = vector.shape_cast %113 : vector<2x8xf32> to vector<2x8x1xf32>
    %115 = vector.broadcast %114 : vector<2x8x1xf32> to vector<2x8x8xf32>
    %116 = arith.subf %112, %115 : vector<2x8x8xf32>
    %117 = math.exp %116 : vector<2x8x8xf32>
    %cst_40 = arith.constant dense<0.000000e+00> : vector<2x8xf32>
    %118 = vector.multi_reduction <add>, %117, %cst_40 [2] : vector<2x8x8xf32> to vector<2x8xf32>
    %119 = vector.shape_cast %118 : vector<2x8xf32> to vector<2x8x1xf32>
    %120 = tpu.reciprocal %119 {approx = true} : vector<2x8x1xf32> -> vector<2x8x1xf32>
    %121 = vector.broadcast %120 : vector<2x8x1xf32> to vector<2x8x8xf32>
    %122 = arith.mulf %117, %121 : vector<2x8x8xf32>
    %cst_41 = arith.constant dense<0.000000e+00> : vector<2x8x8xf32>
    %123 = tpu.matmul %122, %109, %cst_41 {dimension_numbers = #tpu.dot_dimension_numbers<[2], [1], [1], [2], [0, 0, 0, 1, 1, 2], [0], [0]>} : vector<2x8x8xf32>, vector<2x8x8xf32>, vector<2x8x8xf32> -> vector<2x8x8xf32>
    %124 = vector.shape_cast %123 : vector<2x8x8xf32> to vector<16x8xf32>
    %125 = vector.extract_strided_slice %41 {offsets = [24, 0], sizes = [8, 32], strides = [1, 1]} : vector<32x32xf32> to vector<8x32xf32>
    %cst_42 = arith.constant dense<0.000000e+00> : vector<16x32xf32>
    %126 = tpu.matmul %124, %125, %cst_42 {dimension_numbers = #tpu.dot_dimension_numbers<[1], [0], [0], [1], [0, 0, 1, 1], [], []>} : vector<16x8xf32>, vector<8x32xf32>, vector<16x32xf32> -> vector<16x32xf32>
    %127 = arith.addf %106, %126 : vector<16x32xf32>
    %128 = arith.addf %0, %127 : vector<16x32xf32>
    %129 = vector.broadcast %4 : vector<1x32xf32> to vector<16x32xf32>
    %130 = arith.addf %128, %129 : vector<16x32xf32>
    %cst_43 = arith.constant dense<0.000000e+00> : vector<16xf32>
    %131 = vector.multi_reduction <add>, %130, %cst_43 [1] : vector<16x32xf32> to vector<16xf32>
    %132 = vector.shape_cast %131 : vector<16xf32> to vector<16x1xf32>
    %cst_44 = arith.constant 3.200000e+01 : f32
    %133 = vector.broadcast %cst_44 : f32 to vector<16x1xf32>
    %134 = arith.divf %132, %133 : vector<16x1xf32>
    %135 = vector.broadcast %134 : vector<16x1xf32> to vector<16x32xf32>
    %136 = arith.subf %130, %135 : vector<16x32xf32>
    %137 = arith.mulf %136, %136 : vector<16x32xf32>
    %cst_45 = arith.constant dense<0.000000e+00> : vector<16xf32>
    %138 = vector.multi_reduction <add>, %137, %cst_45 [1] : vector<16x32xf32> to vector<16xf32>
    %139 = vector.shape_cast %138 : vector<16xf32> to vector<16x1xf32>
    %cst_46 = arith.constant 3.200000e+01 : f32
    %140 = vector.broadcast %cst_46 : f32 to vector<16x1xf32>
    %141 = arith.divf %139, %140 : vector<16x1xf32>
    %142 = vector.broadcast %134 : vector<16x1xf32> to vector<16x32xf32>
    %143 = arith.subf %130, %142 : vector<16x32xf32>
    %cst_47 = arith.constant 9.99999974E-6 : f32
    %144 = vector.broadcast %cst_47 : f32 to vector<16x1xf32>
    %145 = arith.addf %141, %144 : vector<16x1xf32>
    %146 = math.rsqrt %145 : vector<16x1xf32>
    %147 = vector.broadcast %146 : vector<16x1xf32> to vector<16x32xf32>
    %148 = arith.mulf %143, %147 : vector<16x32xf32>
    %149 = vector.broadcast %5 : vector<1x32xf32> to vector<16x32xf32>
    %150 = arith.mulf %148, %149 : vector<16x32xf32>
    %151 = vector.broadcast %6 : vector<1x32xf32> to vector<16x32xf32>
    %152 = arith.addf %150, %151 : vector<16x32xf32>
    %c0_48 = arith.constant 0 : index
    %c0_49 = arith.constant 0 : index
    %153 = vector.load %arg3[%c0_48, %c0_49] : memref<32x128xf32, #tpu.memory_space<vmem>>, vector<32x128xf32>
    %cst_50 = arith.constant dense<0.000000e+00> : vector<16x128xf32>
    %154 = tpu.matmul %152, %153, %cst_50 {dimension_numbers = #tpu.dot_dimension_numbers<[1], [0], [0], [1], [0, 0, 1, 1], [], []>} : vector<16x32xf32>, vector<32x128xf32>, vector<16x128xf32> -> vector<16x128xf32>
    %155 = vector.broadcast %7 : vector<1x128xf32> to vector<16x128xf32>
    %156 = arith.addf %154, %155 : vector<16x128xf32>
    %cst_51 = arith.constant 0.000000e+00 : f32
    %157 = vector.broadcast %cst_51 : f32 to vector<16x128xf32>
    %158 = arith.maximumf %156, %157 : vector<16x128xf32>
    %c0_52 = arith.constant 0 : index
    %c0_53 = arith.constant 0 : index
    %159 = vector.load %arg4[%c0_52, %c0_53] : memref<128x32xf32, #tpu.memory_space<vmem>>, vector<128x32xf32>
    %cst_54 = arith.constant dense<0.000000e+00> : vector<16x32xf32>
    %160 = tpu.matmul %158, %159, %cst_54 {dimension_numbers = #tpu.dot_dimension_numbers<[1], [0], [0], [1], [0, 0, 1, 1], [], []>} : vector<16x128xf32>, vector<128x32xf32>, vector<16x32xf32> -> vector<16x32xf32>
    %161 = vector.broadcast %8 : vector<1x32xf32> to vector<16x32xf32>
    %162 = arith.addf %160, %161 : vector<16x32xf32>
    %163 = arith.addf %130, %162 : vector<16x32xf32>
    %c0_55 = arith.constant 0 : index
    %c0_56 = arith.constant 0 : index
    %164 = vector.load %arg5[%c0_55, %c0_56] : memref<16x32xf32, #tpu.memory_space<vmem>>, vector<16x32xf32>
    tpu.vector_store %arg5[%c0_55, %c0_56], %163 {strides = array<i32>} : memref<16x32xf32, #tpu.memory_space<vmem>>, vector<16x32xf32>,
    return
  }
}

</mosaic_0001>

<bundles_post_ra>
// kernel: tpu_custom_call.1
= control target key start
LH: loop header
LB: loop body
LE: loop exit
PB: predicated region body
PF: predicated region fallthrough
CT: control target
= control target key end

     0   :  { %10 = vsyncpa [#allocation3], 0  ;;  %s1523_s0 = inlined_call_operand.hbm [shape: f32[16,32], index: 0, kind: input, shape index: {}]   ;;  %s1524_s1 = inlined_call_operand.hbm [shape: f32[8,128], index: 1, kind: input, shape index: {}]   ;;  %s1525_s2 = inlined_call_operand.vmem [shape: f32[4,32,32], index: 2, kind: input, shape index: {}]   ;;  %s1526_s3 = inlined_call_operand.vmem [shape: f32[32,128], index: 3, kind: input, shape index: {}]   ;;  %s1527_s4 = inlined_call_operand.vmem [shape: f32[128,32], index: 4, kind: input, shape index: {}]   ;;  %s1528_s5 = inlined_call_operand.hbm [shape: f32[16,32], index: 5, kind: output, shape index: {}]  }
   0x1   :  { %11 = vsyncpa [#allocation6], 0 }
   0x2   :  { %12 = vsyncpa [#allocation4], 0  ;;  %s17_s20 = sshll.u32 %s1523_s0, 4  ;;  %s1188_s21 = smov [#allocation2]   ;;  %s18_s20 = int_to_ptr.hbm [resolvable:$true] %s17_s20 }
   0x3   :  { %s19_s22 = sshll.u32 %s1188_s21, 4  ;;  %s31_s25 = sshll.u32 %s1524_s1, 4  ;;  %s20_s22 = int_to_ptr.vmem [resolvable:$true] %s19_s22  ;;  %s32_s25 = int_to_ptr.hbm [resolvable:$true] %s31_s25 }
   0x4   :  { %s1189_s26 = smov 128   ;;  %s1190_s27 = smov 8  }
   0x5   :  { %25 = dma.hbm_to_vmem [thread:$0]  %s18_s20, 256, %s20_s22, [#allocation3], %s1189_s26, %s1189_s26, %s1190_s27  }
   0x6   :  { %s1191_s28 = smov [#allocation5]  }
   0x7   :  { %s33_s29 = sshll.u32 %s1191_s28, 4  ;;  %s34_s29 = int_to_ptr.vmem [resolvable:$true] %s33_s29 }
   0x8   :  { %36 = dma.hbm_to_vmem [thread:$0]  %s32_s25, 128, %s34_s29, [#allocation6]  }
   0x9   :  { %1182 = dma.done.wait [#allocation3], 256  }
   0xa   :  { %1183 = vsyncadd [#allocation3], 4294967040 }
   0xb   :  { %1184 = dma.done.wait [#allocation6], 128  }
   0xc   :  { %1185 = vsyncadd [#allocation6], 4294967168  ;;  %vm54_vm0 = vcmask 261120   ;;  %v1236_v0 = vld [vmem:[#allocation2] sm:$0xff]  ;;  %v1238_v1 = vld [vmem:[#allocation2 + $0x8] sm:$0xff]  ;;  %v1192_v4 = vmov 32.0  }
   0xd   :  { %v55_v2 = vsel %vm54_vm0, %v1236_v0, 0.0  ;;  %v58_v3 = vsel %vm54_vm0, %v1238_v1, 0.0  ;;  %1068 = vrcp.f32 %v1192_v4  ;;  %v115_v21 = vld [vmem:[%s1525_s2 + $0x18] sm:$0xff]  ;;  %v114_v23 = vld [vmem:[%s1525_s2 + $0x10] sm:$0xff]  ;;  %v113_v25 = vld [vmem:[%s1525_s2 + $0x8] sm:$0xff]  ;;  %vm206_vm8 = vcmask 64512  }
   0xe   :  { %56 = vadd.xlane.f32.xlu0 %v55_v2  ;;  %59 = vadd.xlane.f32.xlu1 %v58_v3  ;;  %v1007_v22 = vld [vmem:[%s1525_s2 + $0x38] sm:$0xff]  ;;  %v1006_v24 = vld [vmem:[%s1525_s2 + $0x30] sm:$0xff]  ;;  %v1005_v26 = vld [vmem:[%s1525_s2 + $0x28] sm:$0xff]  ;;  %s1193_s29 = smov 120   ;;  %s1194_s0 = smov 112  }
   0xf   :  { %134 = vmatpush.msra.mxu0 %v115_v21  ;;  %162 = vmatpush.msra.mxu2 %v1007_v22  ;;  %v112_v27 = vld [vmem:[%s1525_s2] sm:$0xff]  ;;  %v1013_v35 = vld [vmem:[%s1525_s2 + $0x58] sm:$0xff]  ;;  %v1012_v36 = vld [vmem:[%s1525_s2 + $0x50] sm:$0xff]  ;;  %s1195_s1 = smov 104  }
  0x10   :  { %v1004_v28 = vld [vmem:[%s1525_s2 + $0x20] sm:$0xff]  ;;  %v1011_v37 = vld [vmem:[%s1525_s2 + $0x48] sm:$0xff]  ;;  %v1298_v48 = vld [vmem:[#allocation5] sm:$0xff] }
  0x11   :  { %135 = vmatpush.msra.mxu0 %v114_v23  ;;  %163 = vmatpush.msra.mxu2 %v1006_v24  ;;  %v1010_v38 = vld [vmem:[%s1525_s2 + $0x40] sm:$0xff]  ;;  %v106_v52 = vperm.slane %v1298_v48, 0  ;;  %v109_v56 = vperm.slane %v1298_v48, 1 }
  0x13   :  { %v1069_v5 = vpop.eup %1068  ;;  %136 = vmatpush.msra.mxu0 %v113_v25  ;;  %164 = vmatpush.msra.mxu2 %v1005_v26 }
  0x14   :  { %v62_v6 = vmul.f32 32.0, %v1069_v5  ;;  %vm66_vm1 = vweird.f32 %v1069_v5 }
  0x15   :  { %137 = vmatpush.msra.mxu0 %v112_v27  ;;  %165 = vmatpush.msra.mxu2 %v1004_v28 }
  0x16   :  { %v63_v7 = vsub.f32 1.0, %v62_v6 }
  0x17   :  { %190 = vmatpush.msrb.mxu2 %v1013_v35 }
  0x18   :  { %v64_v8 = vmul.f32 %v1069_v5, %v63_v7 }
  0x19   :  { %191 = vmatpush.msrb.mxu2 %v1012_v36 }
  0x1a   :  { %v65_v9 = vadd.f32 %v1069_v5, %v64_v8 }
  0x1b   :  { %192 = vmatpush.msrb.mxu2 %v1011_v37 }
  0x1c   :  { %v1244_v10 = vsel %vm66_vm1, %v1069_v5, %v65_v9 }
  0x1d   :  { %193 = vmatpush.msrb.mxu2 %v1010_v38 }
  0x81   :  { %v57_v11 = vpop.xlane.xlu0 %56  ;;  %v60_v12 = vpop.xlane.xlu1 %59 }
  0x82   :  { %v68_v13 = vmul.f32 %v1244_v10, %v57_v11  ;;  %v69_v14 = vmul.f32 %v1244_v10, %v60_v12 }
  0x84   :  { %v1249_v15 = vsub.f32 %v1236_v0, %v68_v13  ;;  %v1252_v16 = vsub.f32 %v1238_v1, %v69_v14 }
  0x86   :  { %v72_v17 = vmul.f32 %v1249_v15, %v1249_v15  ;;  %v73_v18 = vmul.f32 %v1252_v16, %v1252_v16 }
  0x88   :  { %v74_v19 = vsel %vm54_vm0, %v72_v17, 0.0  ;;  %v77_v20 = vsel %vm54_vm0, %v73_v18, 0.0 }
  0x89   :  { %75 = vadd.xlane.f32.xlu0 %v74_v19  ;;  %78 = vadd.xlane.f32.xlu1 %v77_v20 }
  0xfc   :  { %v76_v29 = vpop.xlane.xlu0 %75  ;;  %v79_v30 = vpop.xlane.xlu1 %78 }
  0xfd   :  { %v80_v31 = vmul.f32 %v76_v29, %v1244_v10  ;;  %v81_v32 = vmul.f32 %v79_v30, %v1244_v10  ;;  %v1016_v29 = vld [vmem:[%s1525_s2 + $0x60] sm:$0xff] }
  0xff   :  { %v82_v33 = vadd.f32 1e-05, %v80_v31  ;;  %v83_v34 = vadd.f32 1e-05, %v81_v32 }
 0x101   :  { %1070 = vrsqrt.f32 %v82_v33  ;;  %vm100_vm2 = vweird.f32 %v83_v34  ;;  %vm90_vm5 = vweird.f32 %v82_v33 }
 0x102   :  { %1072 = vrsqrt.f32 %v83_v34 }
 0x107   :  { %v1071_v39 = vpop.eup %1070 }
 0x108   :  { %v1073_v40 = vpop.eup %1072  ;;  %v85_v41 = vmul.f32 %v1071_v39, %v82_v33  ;;  %vm91_vm4 = vweird.f32 %v1071_v39 }
 0x109   :  { %v95_v42 = vmul.f32 %v1073_v40, %v83_v34  ;;  %vm101_vm3 = vweird.f32 %v1073_v40  ;;  %vm92_vm7 = vmor %vm90_vm5, %vm91_vm4 }
 0x10a   :  { %v86_v43 = vmul.f32 %v1071_v39, %v85_v41  ;;  %vm102_vm6 = vmor %vm100_vm2, %vm101_vm3 }
 0x10b   :  { %v96_v44 = vmul.f32 %v1073_v40, %v95_v42 }
 0x10c   :  { %v87_v45 = vmul.f32 0.5, %v86_v43 }
 0x10d   :  { %v97_v46 = vmul.f32 0.5, %v96_v44 }
 0x10e   :  { %v88_v47 = vsub.f32 1.5, %v87_v45 }
 0x10f   :  { %v98_v49 = vsub.f32 1.5, %v97_v46 }
 0x110   :  { %v89_v50 = vmul.f32 %v1071_v39, %v88_v47 }
 0x111   :  { %v99_v51 = vmul.f32 %v1073_v40, %v98_v49 }
 0x112   :  { %v93_v53 = vsel %vm92_vm7, %v1071_v39, %v89_v50 }
 0x113   :  { %v103_v54 = vsel %vm102_vm6, %v1073_v40, %v99_v51  ;;  %v104_v55 = vmul.f32 %v93_v53, %v1249_v15 }
 0x114   :  { %v105_v58 = vmul.f32 %v103_v54, %v1252_v16 }
 0x115   :  { %v107_v57 = vmul.f32 %v106_v52, %v104_v55 }
 0x116   :  { %v108_v60 = vmul.f32 %v106_v52, %v105_v58 }
 0x117   :  { %v110_v59 = vadd.f32 %v109_v56, %v107_v57  ;;  %v1017_v57 = vld [vmem:[%s1525_s2 + $0x68] sm:$0xff] }
 0x118   :  { %v111_v61 = vadd.f32 %v109_v56, %v108_v60 }
 0x119   :  { %1002 = vmatmul.msk.f32.vlgmr.msra.gmra.mxu0 %vm54_vm0, %v110_v59  ;;  %1008 = vmatmul.msk.f32.vlgmr.msra.gmra.mxu2 %vm54_vm0, %v110_v59 }
 0x121   :  { %1009 = vmatmul.msk.f32.gmra.mxu2 %vm54_vm0, %v111_v61  ;;  %1003 = vmatmul.msk.f32.gmra.mxu0 %vm54_vm0, %v111_v61 }
 0x129   :  { %1014 = vmatmul.msk.f32.vlgmr.msrb.gmra.mxu2 %vm54_vm0, %v110_v59 }
 0x131   :  { %1015 = vmatmul.msk.f32.gmra.mxu2 %vm54_vm0, %v111_v61 }
 0x196   :  { %v1312_v63 = vpop.f32.mrf.mxu0 }
 0x19c   :  { %v167_v62 = vpop.f32.mrf.mxu2 }
 0x19d   :  { %331 = vrot.lane.b32.xlu2 %v167_v62, %s1193_s29  ;;  %1020 = vmatpush.xpose.msk.msra.mxu3 %vm206_vm8, %v167_v62 }
 0x19e   :  { %v1328_v5 = vpop.f32.mrf.mxu0 }
 0x1a0   :  { %1021 = vmatmul.msk.f32.vlgmr.msra.gmra.mxu3 %vm206_vm8, %v1312_v63 }
 0x1a4   :  { %v1316_v2 = vpop.f32.mrf.mxu2 }
 0x1a5   :  { %329 = vrot.lane.b32.xlu2 %v1312_v63, %s1193_s29  ;;  %1022 = vmatpush.xpose.msk.msrb.mxu3 %vm206_vm8, %v1316_v2 }
 0x1a8   :  { %1023 = vmatmul.msk.f32.vlgmr.msrb.gmra.mxu3 %vm206_vm8, %v1328_v5 }
 0x1ac   :  { %v1322_v3 = vpop.f32.mrf.mxu2 }
 0x1ad   :  { %301 = vmatpush.msra.mxu3 %v1322_v3 }
 0x1b4   :  { %v1325_v4 = vpop.f32.mrf.mxu2 }
 0x1b5   :  { %324 = vmatpush.msrb.mxu0 %v1325_v4 }
 0x1f7   :  { %v332_v6 = vpop.permute.xlu2 %331 }
 0x1f8   :  { %1026 = vmatpush.xpose.msk.msra.mxu1 %vm206_vm8, %v332_v6 }
 0x1fc   :  { %484 = vmatpush.msrb.mxu1 %v1017_v57 }
 0x1ff   :  { %v330_v7 = vpop.permute.xlu2 %329 }
 0x200   :  { %1027 = vmatmul.msk.f32.vlgmr.msra.gmra.mxu1 %vm206_vm8, %v330_v7 }
 0x223   :  { %v230_v8 = vpop.f32.mrf.mxu3 }
 0x224   :  { %v259_v9 = vmul.f32 0.35355338, %v230_v8 }
 0x226   :  { %v261_v11 = vsel %vm206_vm8, %v259_v9, -inf }
 0x227   :  { %262 = vmax.xlane.f32.xlu0 %v261_v11 }
 0x22b   :  { %v256_v20 = vpop.f32.mrf.mxu3 }
 0x22c   :  { %v260_v21 = vmul.f32 0.35355338, %v256_v20 }
 0x22e   :  { %v264_v23 = vsel %vm206_vm8, %v260_v21, -inf }
 0x23b   :  { %359 = vrot.lane.b32.xlu0 %v1316_v2, %s1193_s29 }
 0x27d   :  { %v354_v12 = vpop.f32.mrf.mxu1 }
 0x27e   :  { %v385_v13 = vmul.f32 0.35355338, %v354_v12 }
 0x280   :  { %v387_v14 = vsel %vm206_vm8, %v385_v13, -inf }
 0x281   :  { %388 = vmax.xlane.f32.xlu1 %v387_v14 }
 0x29a   :  { %410 = vrot.lane.b32.xlu1 %v1322_v3, %s1193_s29  ;;  %v263_v15 = vpop.xlane.xlu0 %262 }
 0x29b   :  { %v267_v16 = vsub.f32 %v259_v9, %v263_v15 }
 0x29d   :  { %v269_v17 = vmul.f32 1.442695, %v267_v16 }
 0x29f   :  { %1074 = vpow2.f32 %v269_v17 }
 0x2a2   :  { %357 = vrot.lane.b32.xlu1 %v1328_v5, %s1193_s29 }
 0x2a5   :  { %v1075_v18 = vpop.eup %1074 }
 0x2a6   :  { %v273_v19 = vsel %vm206_vm8, %v1075_v18, 0.0 }
 0x2a7   :  { %274 = vadd.xlane.f32.xlu2 %v273_v19 }
 0x2aa   :  { %521 = vrot.lane.b32.xlu1 %v1312_v63, %s1194_s0 }
 0x2ad   :  { %v360_v22 = vpop.permute.xlu0 %359 }
 0x2ae   :  { %1028 = vmatpush.xpose.msk.msra.mxu2 %vm206_vm8, %v360_v22 }
 0x2af   :  { %265 = vmax.xlane.f32.xlu2 %v264_v23 }
 0x2b2   :  { %513 = vmatpush.msrb.mxu2 %v1016_v29 }
 0x2c7   :  { %437 = vrot.lane.b32.xlu2 %v1325_v4, %s1193_s29  ;;  %s988_s29 = sshll.u32 %s1528_s5, 4  ;;  %s989_s29 = int_to_ptr.hbm [resolvable:$true] %s988_s29 }
 0x2cf   :  { %686 = vrot.lane.b32.xlu2 %v167_v62, %s1195_s1 }
 0x2f4   :  { %v389_v24 = vpop.xlane.xlu1 %388 }
 0x2f5   :  { %v393_v25 = vsub.f32 %v385_v13, %v389_v24 }
 0x2f7   :  { %v395_v26 = vmul.f32 1.442695, %v393_v25 }
 0x2f9   :  { %1076 = vpow2.f32 %v395_v26 }
 0x2ff   :  { %v1077_v27 = vpop.eup %1076 }
 0x300   :  { %v399_v28 = vsel %vm206_vm8, %v1077_v27, 0.0 }
 0x301   :  { %400 = vadd.xlane.f32.xlu0 %v399_v28 }
 0x30c   :  { %v411_v30 = vpop.permute.xlu1 %410 }
 0x30d   :  { %431 = vmatpush.msrb.mxu3 %v411_v30 }
 0x314   :  { %v358_v31 = vpop.permute.xlu1 %357 }
 0x315   :  { %523 = vrot.lane.b32.xlu0 %v167_v62, %s1194_s0  ;;  %1029 = vmatmul.msk.f32.vlgmr.msra.gmra.mxu2 %vm206_vm8, %v358_v31 }
 0x31a   :  { %v275_v32 = vpop.xlane.xlu2 %274 }
 0x31b   :  { %1078 = vrcp.f32 %v275_v32 }
 0x31c   :  { %v522_v46 = vpop.permute.xlu1 %521 }
 0x321   :  { %v1079_v33 = vpop.eup %1078 }
 0x322   :  { %v281_v34 = vmul.f32 %v1079_v33, %v1075_v18  ;;  %v266_v35 = vpop.xlane.xlu2 %265 }
 0x323   :  { %v268_v37 = vsub.f32 %v260_v21, %v266_v35 }
 0x324   :  { %1024 = vmatmul.msk.f32.vlgmr.msra.gmra.mxu3 %vm206_vm8, %v281_v34 }
 0x325   :  { %v271_v38 = vmul.f32 1.442695, %v268_v37 }
 0x327   :  { %1080 = vpow2.f32 %v271_v38 }
 0x32a   :  { %v438_v36 = vpop.permute.xlu2 %437 }
 0x32b   :  { %458 = vmatpush.msra.mxu0 %v438_v36 }
 0x32d   :  { %v1081_v40 = vpop.eup %1080 }
 0x32e   :  { %v276_v41 = vsel %vm206_vm8, %v1081_v40, 0.0 }
 0x332   :  { %v687_v39 = vpop.permute.xlu2 %686 }
 0x333   :  { %1044 = vmatpush.xpose.msk.msra.mxu2 %vm206_vm8, %v687_v39 }
 0x33f   :  { %277 = vadd.xlane.f32.xlu0 %v276_v41 }
 0x353   :  { %601 = vrot.lane.b32.xlu0 %v1322_v3, %s1194_s0 }
 0x35b   :  { %714 = vrot.lane.b32.xlu0 %v1316_v2, %s1195_s1 }
 0x363   :  { %712 = vrot.lane.b32.xlu0 %v1328_v5, %s1195_s1 }
 0x374   :  { %v401_v42 = vpop.xlane.xlu0 %400 }
 0x375   :  { %1082 = vrcp.f32 %v401_v42 }
 0x37b   :  { %v1083_v43 = vpop.eup %1082 }
 0x37c   :  { %v407_v44 = vmul.f32 %v1083_v43, %v1077_v27 }
 0x37e   :  { %1030 = vmatmul.msk.f32.vlgmr.msrb.gmra.mxu3 %vm206_vm8, %v407_v44 }
 0x387   :  { %v524_v45 = vpop.permute.xlu0 %523 }
 0x388   :  { %1036 = vmatpush.xpose.msk.msra.mxu3 %vm206_vm8, %v524_v45 }
 0x38b   :  { %1037 = vmatmul.msk.f32.vlgmr.msra.gmra.mxu3 %vm206_vm8, %v522_v46 }
 0x398   :  { %v382_v47 = vpop.f32.mrf.mxu2 }
 0x399   :  { %v386_v49 = vmul.f32 0.35355338, %v382_v47 }
 0x39b   :  { %v390_v50 = vsel %vm206_vm8, %v386_v49, -inf }
 0x39c   :  { %391 = vmax.xlane.f32.xlu1 %v390_v50 }
 0x3a7   :  { %v303_v51 = vpop.f32.mrf.mxu3 }
 0x3a8   :  { %1034 = vmatmul.msk.f32.vlgmr.msrb.gmra.mxu2 %vm206_vm8, %v303_v51 }
 0x3b2   :  { %v278_v52 = vpop.xlane.xlu0 %277 }
 0x3b3   :  { %1084 = vrcp.f32 %v278_v52 }
 0x3b5   :  { %551 = vrot.lane.b32.xlu1 %v1316_v2, %s1194_s0 }
 0x3b9   :  { %v1085_v53 = vpop.eup %1084 }
 0x3ba   :  { %v282_v54 = vmul.f32 %v1085_v53, %v1081_v40 }
 0x3bc   :  { %1025 = vmatmul.msk.f32.vlgmr.msrb.gmra.mxu0 %vm206_vm8, %v282_v54 }
 0x3c5   :  { %v602_v55 = vpop.permute.xlu0 %601 }
 0x3c6   :  { %622 = vmatpush.msrb.mxu3 %v602_v55 }
 0x3cd   :  { %v715_v56 = vpop.permute.xlu0 %714 }
 0x3ce   :  { %1046 = vmatpush.xpose.msk.msra.mxu3 %vm206_vm8, %v715_v56 }
 0x3d5   :  { %v713_v28 = vpop.permute.xlu0 %712 }
 0x401   :  { %v433_v58 = vpop.f32.mrf.mxu3 }
 0x402   :  { %1032 = vmatmul.msk.f32.vlgmr.msrb.gmra.mxu1 %vm206_vm8, %v433_v58  ;;  %v1063_v58 = vpack.i.bf16 %v1325_v4, %v1322_v3 }
 0x40e   :  { %v546_v6 = vpop.f32.mrf.mxu3 }
 0x40f   :  { %v392_v59 = vpop.xlane.xlu1 %391  ;;  %v577_v7 = vmul.f32 0.35355338, %v546_v6 }
 0x410   :  { %v394_v60 = vsub.f32 %v386_v49, %v392_v59 }
 0x411   :  { %v579_v8 = vsel %vm206_vm8, %v577_v7, -inf }
 0x412   :  { %v397_v61 = vmul.f32 1.442695, %v394_v60 }
 0x414   :  { %1086 = vpow2.f32 %v397_v61 }
 0x41a   :  { %v1087_v62 = vpop.eup %1086 }
 0x41b   :  { %v402_v2 = vsel %vm206_vm8, %v1087_v62, 0.0 }
 0x41c   :  { %403 = vadd.xlane.f32.xlu2 %v402_v2 }
 0x424   :  { %580 = vmax.xlane.f32.xlu2 %v579_v8 }
 0x427   :  { %v552_v9 = vpop.permute.xlu1 %551 }
 0x428   :  { %1038 = vmatpush.xpose.msk.msrb.mxu0 %vm206_vm8, %v552_v9 }
 0x42b   :  { %v1397_v29 = vpop.f32.mrf.mxu2 }
 0x439   :  { %v326_v11 = vpop.f32.mrf.mxu0 }
 0x43a   :  { %1035 = vmatmul.msk.f32.gmra.mxu2 %vm206_vm8, %v326_v11 }
 0x43c   :  { %549 = vrot.lane.b32.xlu2 %v1328_v5, %s1194_s0 }
 0x48f   :  { %v404_v12 = vpop.xlane.xlu2 %403 }
 0x490   :  { %1088 = vrcp.f32 %v404_v12 }
 0x496   :  { %v1089_v13 = vpop.eup %1088 }
 0x497   :  { %v408_v14 = vmul.f32 %v1089_v13, %v1087_v62  ;;  %v581_v15 = vpop.xlane.xlu2 %580  ;;  %v486_v13 = vpop.f32.mrf.mxu1 }
 0x498   :  { %v585_v16 = vsub.f32 %v577_v7, %v581_v15 }
 0x499   :  { %1031 = vmatmul.msk.f32.vlgmr.msra.gmra.mxu0 %vm206_vm8, %v408_v14 }
 0x49a   :  { %v587_v17 = vmul.f32 1.442695, %v585_v16  ;;  %v516_v16 = vadd.f32 %v1397_v29, %v486_v13 }
 0x49c   :  { %1090 = vpow2.f32 %v587_v17 }
 0x49f   :  { %v550_v18 = vpop.permute.xlu2 %549 }
 0x4a1   :  { %1039 = vmatmul.msk.f32.vlgmr.msrb.gmra.mxu0 %vm206_vm8, %v550_v18 }
 0x4a2   :  { %v1091_v19 = vpop.eup %1090 }
 0x4a3   :  { %v591_v20 = vsel %vm206_vm8, %v1091_v19, 0.0 }
 0x4a4   :  { %592 = vadd.xlane.f32.xlu2 %v591_v20  ;;  %v849_v20 = vperm.slane %v1298_v48, 2 }
 0x4bc   :  { %684 = vrot.lane.b32.xlu2 %v1312_v63, %s1195_s1  ;;  %v1018_v63 = vld [vmem:[%s1525_s2 + $0x70] sm:$0xff] }
 0x4bd   :  { %674 = vmatpush.msra.mxu1 %v1018_v63  ;;  %v1399_v33 = vpop.f32.mrf.mxu2 }
 0x516   :  { %v460_v5 = vpop.f32.mrf.mxu0 }
 0x517   :  { %1033 = vmatmul.msk.f32.gmra.mxu1 %vm206_vm8, %v460_v5  ;;  %v593_v21 = vpop.xlane.xlu2 %592 }
 0x518   :  { %1092 = vrcp.f32 %v593_v21 }
 0x51e   :  { %v1093_v22 = vpop.eup %1092  ;;  %v574_v23 = vpop.f32.mrf.mxu0 }
 0x51f   :  { %v599_v24 = vmul.f32 %v1093_v22, %v1091_v19  ;;  %v578_v25 = vmul.f32 0.35355338, %v574_v23  ;;  %v685_v26 = vpop.permute.xlu2 %684 }
 0x520   :  { %1045 = vmatmul.msk.f32.vlgmr.msra.gmra.mxu2 %vm206_vm8, %v685_v26 }
 0x521   :  { %1040 = vmatmul.msk.f32.vlgmr.msrb.gmra.mxu3 %vm206_vm8, %v599_v24  ;;  %v582_v27 = vsel %vm206_vm8, %v578_v25, -inf }
 0x522   :  { %583 = vmax.xlane.f32.xlu1 %v582_v27 }
 0x529   :  { %1047 = vmatmul.msk.f32.vlgmr.msra.gmra.mxu3 %vm206_vm8, %v713_v28 }
 0x594   :  { %v489_v14 = vpop.f32.mrf.mxu1 }
 0x595   :  { %v584_v30 = vpop.xlane.xlu1 %583  ;;  %v519_v24 = vadd.f32 %v1399_v33, %v489_v14  ;;  %v943_v14 = vld [vmem:[%s1527_s4 + $0x28] sm:$0xff] }
 0x596   :  { %v586_v31 = vsub.f32 %v578_v25, %v584_v30 }
 0x598   :  { %v589_v32 = vmul.f32 1.442695, %v586_v31 }
 0x59a   :  { %1094 = vpow2.f32 %v589_v32 }
 0x5a0   :  { %v1095_v34 = vpop.eup %1094 }
 0x5a1   :  { %v594_v35 = vsel %vm206_vm8, %v1095_v34, 0.0 }
 0x5a2   :  { %595 = vadd.xlane.f32.xlu1 %v594_v35 }
 0x5a3   :  { %v709_v36 = vpop.f32.mrf.mxu2 }
 0x5a4   :  { %v740_v37 = vmul.f32 0.35355338, %v709_v36  ;;  %v624_v38 = vpop.f32.mrf.mxu3 }
 0x5a5   :  { %1042 = vmatmul.msk.f32.vlgmr.msra.gmra.mxu1 %vm206_vm8, %v624_v38  ;;  %v905_v38 = vld [vmem:[%s1526_s3 + $0x18] sm:$0xff] }
 0x5a6   :  { %v742_v39 = vsel %vm206_vm8, %v740_v37, -inf }
 0x5a7   :  { %743 = vmax.xlane.f32.xlu2 %v742_v39  ;;  %v904_v39 = vld [vmem:[%s1526_s3 + $0x10] sm:$0xff] }
 0x5ac   :  { %v737_v40 = vpop.f32.mrf.mxu3 }
 0x5ad   :  { %v741_v41 = vmul.f32 0.35355338, %v737_v40  ;;  %v903_v40 = vld [vmem:[%s1526_s3 + $0x8] sm:$0xff] }
 0x5af   :  { %v745_v42 = vsel %vm206_vm8, %v741_v41, -inf }
 0x5b0   :  { %746 = vmax.xlane.f32.xlu0 %v745_v42 }
 0x5c4   :  { %627 = vrot.lane.b32.xlu0 %v1325_v4, %s1194_s0  ;;  %v1019_v4 = vld [vmem:[%s1525_s2 + $0x78] sm:$0xff] }
 0x5c5   :  { %837 = vmatpush.msrb.mxu3 %v1019_v4 }
 0x615   :  { %v596_v52 = vpop.xlane.xlu1 %595 }
 0x61a   :  { %v744_v43 = vpop.xlane.xlu2 %743 }
 0x61b   :  { %v748_v44 = vsub.f32 %v740_v37, %v744_v43 }
 0x61d   :  { %v750_v45 = vmul.f32 1.442695, %v748_v44 }
 0x61f   :  { %1096 = vpow2.f32 %v750_v45  ;;  %v953_v45 = vld [vmem:[%s1527_s4 + $0x78] sm:$0xff] }
 0x620   :  { %955 = vmatpush.msrb.mxu1 %v953_v45 }
 0x622   :  { %v676_v15 = vpop.f32.mrf.mxu1 }
 0x623   :  { %v747_v46 = vpop.xlane.xlu0 %746  ;;  %v682_v17 = vadd.f32 %v676_v15, %v516_v16  ;;  %v942_v16 = vld [vmem:[%s1527_s4 + $0x20] sm:$0xff] }
 0x624   :  { %v749_v47 = vsub.f32 %v741_v41, %v747_v46  ;;  %v902_v41 = vld [vmem:[%s1526_s3] sm:$0xff]  ;;  %v952_v46 = vld [vmem:[%s1527_s4 + $0x70] sm:$0xff] }
 0x625   :  { %v1097_v49 = vpop.eup %1096  ;;  %956 = vmatpush.msrb.mxu1 %v952_v46 }
 0x626   :  { %v752_v50 = vmul.f32 1.442695, %v749_v47  ;;  %v754_v51 = vsel %vm206_vm8, %v1097_v49, 0.0 }
 0x627   :  { %755 = vadd.xlane.f32.xlu2 %v754_v51 }
 0x628   :  { %1098 = vpow2.f32 %v752_v50  ;;  %v951_v50 = vld [vmem:[%s1527_s4 + $0x68] sm:$0xff] }
 0x629   :  { %1100 = vrcp.f32 %v596_v52  ;;  %957 = vmatpush.msrb.mxu1 %v951_v50 }
 0x62e   :  { %v1099_v53 = vpop.eup %1098 }
 0x62f   :  { %v757_v54 = vsel %vm206_vm8, %v1099_v53, 0.0  ;;  %v1101_v55 = vpop.eup %1100 }
 0x630   :  { %758 = vadd.xlane.f32.xlu1 %v757_v54  ;;  %v600_v56 = vmul.f32 %v1101_v55, %v1095_v34  ;;  %v950_v54 = vld [vmem:[%s1527_s4 + $0x60] sm:$0xff] }
 0x631   :  { %958 = vmatpush.msrb.mxu1 %v950_v54 }
 0x636   :  { %v628_v57 = vpop.permute.xlu0 %627 }
 0x637   :  { %648 = vmatpush.msra.mxu0 %v628_v57  ;;  %v949_v57 = vld [vmem:[%s1527_s4 + $0x58] sm:$0xff] }
 0x638   :  { %1041 = vmatmul.msk.f32.vlgmr.msra.gmra.mxu0 %vm206_vm8, %v600_v56  ;;  %959 = vmatpush.msrb.mxu1 %v949_v57 }
 0x63f   :  { %1064 = vrot.lane.b32.xlu2 %v1063_v58, %s1195_s1 }
 0x69a   :  { %v756_v59 = vpop.xlane.xlu2 %755 }
 0x69b   :  { %1102 = vrcp.f32 %v756_v59  ;;  %v948_v59 = vld [vmem:[%s1527_s4 + $0x50] sm:$0xff] }
 0x69c   :  { %960 = vmatpush.msrb.mxu1 %v948_v59 }
 0x6a1   :  { %v1103_v60 = vpop.eup %1102 }
 0x6a2   :  { %v1065_v61 = vpop.permute.xlu2 %1064  ;;  %v762_v7 = vmul.f32 %v1103_v60, %v1097_v49  ;;  %v947_v60 = vld [vmem:[%s1527_s4 + $0x48] sm:$0xff] }
 0x6a3   :  { %v1067_v62 = vunpack.i.h.bf16 %v1065_v61  ;;  %v1066_v2 = vunpack.i.l.bf16 %v1065_v61  ;;  %v759_v6 = vpop.xlane.xlu1 %758  ;;  %v896_v61 = vperm.slane %v1298_v48, 3  ;;  %961 = vmatpush.msrb.mxu1 %v947_v60 }
 0x6a4   :  { %1104 = vrcp.f32 %v759_v6 }
 0x6a5   :  { %785 = vmatpush.msrb.mxu0 %v1066_v2  ;;  %811 = vmatpush.msrb.mxu2 %v1067_v62  ;;  %v946_v2 = vld [vmem:[%s1527_s4 + $0x40] sm:$0xff] }
 0x6a6   :  { %1048 = vmatmul.msk.f32.vlgmr.msrb.gmra.mxu0 %vm206_vm8, %v762_v7  ;;  %v899_v7 = vperm.slane %v1298_v48, 4  ;;  %962 = vmatpush.msrb.mxu1 %v946_v2 }
 0x6a7   :  { %925 = vmatpush.msra.mxu0 %v905_v38 }
 0x6a9   :  { %926 = vmatpush.msra.mxu0 %v904_v39 }
 0x6aa   :  { %v1105_v8 = vpop.eup %1104 }
 0x6ab   :  { %v763_v9 = vmul.f32 %v1105_v8, %v1099_v53  ;;  %927 = vmatpush.msra.mxu0 %v903_v40 }
 0x6ad   :  { %1049 = vmatmul.msk.f32.vlgmr.msrb.gmra.mxu2 %vm206_vm8, %v763_v9  ;;  %928 = vmatpush.msra.mxu0 %v902_v41  ;;  %v945_v9 = vld [vmem:[%s1527_s4 + $0x38] sm:$0xff] }
 0x6ae   :  { %963 = vmatpush.msrb.mxu1 %v945_v9 }
 0x6b5   :  { %v650_v3 = vpop.f32.mrf.mxu0 }
 0x6b6   :  { %1043 = vmatmul.msk.f32.gmra.mxu1 %vm206_vm8, %v650_v3 }
 0x723   :  { %v787_v11 = vpop.f32.mrf.mxu0 }
 0x724   :  { %1050 = vmatmul.msk.f32.vlgmr.msrb.gmra.mxu3 %vm206_vm8, %v787_v11  ;;  %v944_v11 = vld [vmem:[%s1527_s4 + $0x30] sm:$0xff] }
 0x725   :  { %964 = vmatpush.msrb.mxu1 %v944_v11 }
 0x727   :  { %965 = vmatpush.msrb.mxu1 %v943_v14 }
 0x729   :  { %966 = vmatpush.msrb.mxu1 %v942_v16 }
 0x730   :  { %v813_v12 = vpop.f32.mrf.mxu2 }
 0x731   :  { %1051 = vmatmul.msk.f32.gmra.mxu3 %vm206_vm8, %v813_v12 }
 0x733   :  { %v679_v23 = vpop.f32.mrf.mxu1 }
 0x734   :  { %v683_v25 = vadd.f32 %v679_v23, %v519_v24  ;;  %v940_v24 = vld [vmem:[%s1527_s4 + $0x10] sm:$0xff] }
 0x7a7   :  { %v839_v18 = vpop.f32.mrf.mxu3 }
 0x7a8   :  { %v845_v19 = vadd.f32 %v839_v18, %v682_v17  ;;  %v941_v18 = vld [vmem:[%s1527_s4 + $0x18] sm:$0xff] }
 0x7a9   :  { %967 = vmatpush.msrb.mxu1 %v941_v18 }
 0x7aa   :  { %v847_v5 = vadd.f32 %v845_v19, %v1236_v0 }
 0x7ab   :  { %968 = vmatpush.msrb.mxu1 %v940_v24 }
 0x7ac   :  { %v1424_v21 = vadd.f32 %v849_v20, %v847_v5 }
 0x7ae   :  { %v852_v22 = vsel %vm54_vm0, %v1424_v21, 0.0 }
 0x7af   :  { %853 = vadd.xlane.f32.xlu1 %v852_v22 }
 0x7b4   :  { %v842_v26 = vpop.f32.mrf.mxu3 }
 0x7b5   :  { %v846_v27 = vadd.f32 %v842_v26, %v683_v25  ;;  %v939_v25 = vld [vmem:[%s1527_s4 + $0x8] sm:$0xff]  ;;  %v938_v26 = vld [vmem:[%s1527_s4] sm:$0xff]  ;;  %s1196_s4 = smov [#allocation7]  }
 0x7b6   :  { %969 = vmatpush.msrb.mxu1 %v939_v25  ;;  %s986_s25 = sshll.u32 %s1196_s4, 4  ;;  %s987_s25 = int_to_ptr.vmem [resolvable:$true] %s986_s25 }
 0x7b7   :  { %v848_v28 = vadd.f32 %v846_v27, %v1238_v1  ;;  %v906_v27 = vperm.slane %v1298_v48, 5 }
 0x7b8   :  { %970 = vmatpush.msrb.mxu1 %v938_v26 }
 0x7b9   :  { %v1430_v63 = vadd.f32 %v849_v20, %v848_v28 }
 0x7bb   :  { %v855_v29 = vsel %vm54_vm0, %v1430_v63, 0.0 }
 0x7bc   :  { %856 = vadd.xlane.f32.xlu1 %v855_v29 }
 0x822   :  { %v854_v0 = vpop.xlane.xlu1 %853 }
 0x823   :  { %v858_v30 = vmul.f32 %v854_v0, %v1244_v10 }
 0x825   :  { %v860_v31 = vsub.f32 %v1424_v21, %v858_v30 }
 0x827   :  { %v862_v32 = vmul.f32 %v860_v31, %v860_v31 }
 0x829   :  { %v864_v34 = vsel %vm54_vm0, %v862_v32, 0.0 }
 0x82a   :  { %865 = vadd.xlane.f32.xlu0 %v864_v34  ;;  %v954_v34 = vperm.slane %v1298_v48, 6 }
 0x82f   :  { %v857_v33 = vpop.xlane.xlu1 %856 }
 0x830   :  { %v859_v35 = vmul.f32 %v857_v33, %v1244_v10 }
 0x832   :  { %v1439_v1 = vsub.f32 %v1430_v63, %v859_v35 }
 0x834   :  { %v863_v36 = vmul.f32 %v1439_v1, %v1439_v1 }
 0x836   :  { %v867_v37 = vsel %vm54_vm0, %v863_v36, 0.0 }
 0x837   :  { %868 = vadd.xlane.f32.xlu1 %v867_v37 }
 0x89d   :  { %v866_v42 = vpop.xlane.xlu0 %865 }
 0x89e   :  { %v870_v43 = vmul.f32 %v866_v42, %v1244_v10 }
 0x8a0   :  { %v872_v44 = vadd.f32 1e-05, %v870_v43 }
 0x8a2   :  { %1106 = vrsqrt.f32 %v872_v44  ;;  %vm880_vm10 = vweird.f32 %v872_v44 }
 0x8a8   :  { %v1107_v47 = vpop.eup %1106 }
 0x8a9   :  { %v875_v49 = vmul.f32 %v1107_v47, %v872_v44  ;;  %vm881_vm9 = vweird.f32 %v1107_v47 }
 0x8aa   :  { %v869_v51 = vpop.xlane.xlu1 %868  ;;  %vm882_vm11 = vmor %vm880_vm10, %vm881_vm9 }
 0x8ab   :  { %v876_v52 = vmul.f32 %v1107_v47, %v875_v49  ;;  %v871_v53 = vmul.f32 %v869_v51, %v1244_v10 }
 0x8ad   :  { %v877_v55 = vmul.f32 0.5, %v876_v52  ;;  %v873_v56 = vadd.f32 1e-05, %v871_v53 }
 0x8af   :  { %v878_v58 = vsub.f32 1.5, %v877_v55  ;;  %1108 = vrsqrt.f32 %v873_v56  ;;  %vm890_vm13 = vweird.f32 %v873_v56 }
 0x8b1   :  { %v879_v10 = vmul.f32 %v1107_v47, %v878_v58 }
 0x8b3   :  { %v883_v62 = vsel %vm882_vm11, %v1107_v47, %v879_v10 }
 0x8b4   :  { %v894_v6 = vmul.f32 %v883_v62, %v860_v31 }
 0x8b5   :  { %v1109_v8 = vpop.eup %1108 }
 0x8b6   :  { %v897_v3 = vmul.f32 %v896_v61, %v894_v6  ;;  %v885_v4 = vmul.f32 %v1109_v8, %v873_v56  ;;  %vm891_vm12 = vweird.f32 %v1109_v8 }
 0x8b7   :  { %vm892_vm14 = vmor %vm890_vm13, %vm891_vm12 }
 0x8b8   :  { %v886_v12 = vmul.f32 %v1109_v8, %v885_v4  ;;  %v900_v13 = vadd.f32 %v899_v7, %v897_v3 }
 0x8ba   :  { %v887_v15 = vmul.f32 0.5, %v886_v12  ;;  %1052 = vmatmul.msk.f32.vlgmr.msra.gmra.mxu0 %vm54_vm0, %v900_v13 }
 0x8bc   :  { %v888_v17 = vsub.f32 1.5, %v887_v15 }
 0x8be   :  { %v889_v19 = vmul.f32 %v1109_v8, %v888_v17 }
 0x8c0   :  { %v893_v20 = vsel %vm892_vm14, %v1109_v8, %v889_v19 }
 0x8c1   :  { %v895_v5 = vmul.f32 %v893_v20, %v1439_v1 }
 0x8c3   :  { %v898_v22 = vmul.f32 %v896_v61, %v895_v5 }
 0x8c5   :  { %v901_v23 = vadd.f32 %v899_v7, %v898_v22 }
 0x8c7   :  { %1053 = vmatmul.msk.f32.gmra.mxu0 %vm54_vm0, %v901_v23 }
 0x937   :  { %v930_v28 = vpop.f32.mrf.mxu0 }
 0x938   :  { %v931_v29 = vadd.f32 %v930_v28, %v906_v27 }
 0x93a   :  { %v936_v0 = vmax.f32 %v931_v29, 0.0 }
 0x93c   :  { %971 = vmatmul.f32.vlgmr.msrb.gmra.mxu1 %v936_v0 }
 0x944   :  { %v933_v30 = vpop.f32.mrf.mxu0 }
 0x945   :  { %v934_v31 = vadd.f32 %v933_v30, %v906_v27 }
 0x947   :  { %v937_v32 = vmax.f32 %v934_v31, 0.0 }
 0x949   :  { %974 = vmatmul.f32.gmra.mxu1 %v937_v32 }
 0x9b9   :  { %v972_v33 = vpop.f32.mrf.mxu1 }
 0x9ba   :  { %v973_v35 = vadd.f32 %v972_v33, %v954_v34 }
 0x9bc   :  { %v978_v1 = vadd.f32 %v973_v35, %v1424_v21 }
 0x9be   :  { %980 = vst.msk [vmem:[#allocation7] sm:$0xff] %vm54_vm0, %v978_v1 }
 0x9c6   :  { %v975_v36 = vpop.f32.mrf.mxu1 }
 0x9c7   :  { %v976_v37 = vadd.f32 %v975_v36, %v954_v34 }
 0x9c9   :  { %v979_v38 = vadd.f32 %v976_v37, %v1430_v63 }
 0x9cb   :  { %981 = vst.msk [vmem:[#allocation7 + $0x8] sm:$0xff] %vm54_vm0, %v979_v38 }
 0x9cc   :  { %994 = dma.vmem_to_hbm [thread:$0]  %s987_s25, 256, %s989_s29, [#allocation4], %s1189_s26, %s1189_s26, %s1190_s27  }
 0x9cd   :  { %1186 = dma.done.wait [#allocation4], 256  }
 0x9ce   :  { %1187 = vsyncadd [#allocation4], 4294967040 }
 0x9cf   :  { %999 = vsyncpa [#allocation3], 1 }
 0x9d0   :  { %1000 = vsyncpa [#allocation6], 1 }
 0x9d1   :  { %1001 = vsyncpa [#allocation4], 1 }

</bundles_post_ra>
